<compile_context>
chip_gen: v5e
topology: v5e:2x2
jax: 0.10.0
libtpu: 0.0.40
codegen_flags: <defaults>
</compile_context>

<pallas_src>
import jax
import jax.numpy as jnp
from jax.experimental import pallas as pl
from jax.experimental.pallas import tpu as pltpu

IN_FEATURES = 784
HIDDEN = 128
OUT_FEATURES = 10

K_PAD = 896      # 7 * 128, padded contraction dim for the first matmul
OUT_PAD = 128    # lane-dense padded output width
TM_MAX = 512     # batch tile; sized for v7x's 32 MiB scoped-VMEM default


def _round_up(x, m):
    return ((x + m - 1) // m) * m


def mlp_kernel(x_ref, w1_ref, b1_ref, w2_ref, b2_ref, o_ref):
    # x: (TM, 896), w1: (896, 128), b1: (1, 128), w2: (128, 128), b2: (1, 128)
    x = x_ref[...]
    h = jnp.dot(x, w1_ref[...], preferred_element_type=jnp.float32) + b1_ref[...]
    h = jnp.maximum(h, 0.0)  # ReLU
    logits = jnp.dot(h, w2_ref[...], preferred_element_type=jnp.float32) + b2_ref[...]
    o_ref[...] = logits.astype(o_ref.dtype)


def simple_nn_forward(x_nchw, w1, b1, w2, b2):
    """x_nchw: (B, C, H, W) with C*H*W == 784. Returns (B, 10) logits."""
    B = x_nchw.shape[0]
    x_flat = x_nchw.reshape(B, -1)  # torch.nn.Flatten()
    assert x_flat.shape[1] == IN_FEATURES

    # --- pad to hardware-friendly shapes (all zero padding; results unaffected) ---
    b_pad = _round_up(B, 8)                 # sublane multiple
    tm = min(TM_MAX, b_pad)                 # batch tile
    b_pad = _round_up(b_pad, tm)            # make grid exact
    grid_m = b_pad // tm

    x_p = jnp.zeros((b_pad, K_PAD), jnp.float32).at[:B, :IN_FEATURES].set(x_flat)
    w1_p = jnp.zeros((K_PAD, HIDDEN), jnp.float32).at[:IN_FEATURES, :].set(w1)
    b1_p = b1.reshape(1, HIDDEN).astype(jnp.float32)
    w2_p = jnp.zeros((HIDDEN, OUT_PAD), jnp.float32).at[:, :OUT_FEATURES].set(w2)
    b2_p = jnp.zeros((1, OUT_PAD), jnp.float32).at[:, :OUT_FEATURES].set(
        b2.reshape(1, OUT_FEATURES)
    )

    weight_bytes = (w1_p.size + b1_p.size + w2_p.size + b2_p.size) * 4
    cost = pl.CostEstimate(
        flops=2 * b_pad * (K_PAD * HIDDEN + HIDDEN * OUT_PAD),
        bytes_accessed=b_pad * K_PAD * 4 + weight_bytes + b_pad * OUT_PAD * 4,
        transcendentals=0,
    )

    out_padded = pl.pallas_call(
        mlp_kernel,
        out_shape=jax.ShapeDtypeStruct((b_pad, OUT_PAD), jnp.float32),
        grid_spec=pltpu.PrefetchScalarGridSpec(
            num_scalar_prefetch=0,
            grid=(grid_m,),
            in_specs=[
                pl.BlockSpec((tm, K_PAD), lambda i: (i, 0)),        # x tile (pipelined)
                pl.BlockSpec((K_PAD, HIDDEN), lambda i: (0, 0)),     # w1 (resident)
                pl.BlockSpec((1, HIDDEN), lambda i: (0, 0)),         # b1 (resident)
                pl.BlockSpec((HIDDEN, OUT_PAD), lambda i: (0, 0)),   # w2 (resident)
                pl.BlockSpec((1, OUT_PAD), lambda i: (0, 0)),        # b2 (resident)
            ],
            out_specs=pl.BlockSpec((tm, OUT_PAD), lambda i: (i, 0)),
        ),
        compiler_params=pltpu.CompilerParams(
            dimension_semantics=("parallel",),
            vmem_limit_bytes=32 * 1024 * 1024,
        ),
        cost_estimate=cost,
    )(x_p, w1_p, b1_p, w2_p, b2_p)

    # Drop batch padding rows and the zero-padded output lanes.
    return out_padded[:B, :OUT_FEATURES]


def init_params(key):
    """Deterministic init mimicking PyTorch Linear default (uniform in ±1/sqrt(fan_in))."""
    k1, k2, k3, k4 = jax.random.split(key, 4)
    bound1 = 1.0 / jnp.sqrt(IN_FEATURES)
    bound2 = 1.0 / jnp.sqrt(HIDDEN)
    w1 = jax.random.uniform(k1, (IN_FEATURES, HIDDEN), jnp.float32, -bound1, bound1)
    b1 = jax.random.uniform(k2, (1, HIDDEN), jnp.float32, -bound1, bound1)
    w2 = jax.random.uniform(k3, (HIDDEN, OUT_FEATURES), jnp.float32, -bound2, bound2)
    b2 = jax.random.uniform(k4, (1, OUT_FEATURES), jnp.float32, -bound2, bound2)
    return w1, b1, w2, b2


if __name__ == "__main__":
    key = jax.random.PRNGKey(0)
    k_x, k_p = jax.random.split(key)

    # MNIST-like input: batch=8, NCHW (8, 1, 28, 28) -> flatten to (8, 784)
    x = jax.random.normal(k_x, (8, 1, 28, 28), dtype=jnp.float32)
    w1, b1, w2, b2 = init_params(k_p)

    logits = simple_nn_forward(x, w1, b1, w2, b2)
    logits = jax.block_until_ready(logits)

    # Reference check in plain JAX
    x_flat = x.reshape(8, -1)
    ref = jnp.maximum(x_flat @ w1 + b1, 0.0) @ w2 + b2
    assert logits.shape == (8, 10)
    assert jnp.allclose(logits, ref, atol=1e-4, rtol=1e-4)

    print("KERNEL_OK")
</pallas_src>

<mosaic_0001>
module attributes {stable_mosaic.version = 11 : i64} {
  func.func @mlp_kernel(%arg0: i32, %arg1: memref<8x896xf32, #tpu.memory_space<vmem>>, %arg2: memref<896x128xf32, #tpu.memory_space<vmem>>, %arg3: memref<1x128xf32, #tpu.memory_space<vmem>>, %arg4: memref<128x128xf32, #tpu.memory_space<vmem>>, %arg5: memref<1x128xf32, #tpu.memory_space<vmem>>, %arg6: memref<8x128xf32, #tpu.memory_space<vmem>>) attributes {dimension_semantics = [#tpu.dimension_semantics<parallel>], iteration_bounds = array<i64: 1>, scalar_prefetch = 0 : i64, scratch_operands = 0 : i64, tpu.core_type = #tpu.core_type<tc>, window_params = [{transform_indices = @transform_0, window_bounds = array<i64: 8, 896>}, {pipeline_mode = #tpu.pipeline_mode<synchronous>, transform_indices = @transform_1, window_bounds = array<i64: 896, 128>}, {pipeline_mode = #tpu.pipeline_mode<synchronous>, transform_indices = @transform_2, window_bounds = array<i64: 1, 128>}, {pipeline_mode = #tpu.pipeline_mode<synchronous>, transform_indices = @transform_3, window_bounds = array<i64: 128, 128>}, {pipeline_mode = #tpu.pipeline_mode<synchronous>, transform_indices = @transform_4, window_bounds = array<i64: 1, 128>}, {transform_indices = @transform_5, window_bounds = array<i64: 8, 128>}]} {
    %c0 = arith.constant 0 : index
    %c0_0 = arith.constant 0 : index
    %0 = vector.load %arg1[%c0, %c0_0] : memref<8x896xf32, #tpu.memory_space<vmem>>, vector<8x896xf32>
    %c0_1 = arith.constant 0 : index
    %c0_2 = arith.constant 0 : index
    %1 = vector.load %arg2[%c0_1, %c0_2] : memref<896x128xf32, #tpu.memory_space<vmem>>, vector<896x128xf32>
    %cst = arith.constant dense<0.000000e+00> : vector<8x128xf32>
    %2 = tpu.matmul %0, %1, %cst {dimension_numbers = #tpu.dot_dimension_numbers<[1], [0], [0], [1], [0, 0, 1, 1], [], []>} : vector<8x896xf32>, vector<896x128xf32>, vector<8x128xf32> -> vector<8x128xf32>
    %c0_3 = arith.constant 0 : index
    %c0_4 = arith.constant 0 : index
    %3 = vector.load %arg3[%c0_3, %c0_4] : memref<1x128xf32, #tpu.memory_space<vmem>>, vector<1x128xf32>
    %4 = vector.broadcast %3 : vector<1x128xf32> to vector<8x128xf32>
    %5 = arith.addf %2, %4 : vector<8x128xf32>
    %cst_5 = arith.constant 0.000000e+00 : f32
    %6 = vector.broadcast %cst_5 : f32 to vector<8x128xf32>
    %7 = arith.maximumf %5, %6 : vector<8x128xf32>
    %c0_6 = arith.constant 0 : index
    %c0_7 = arith.constant 0 : index
    %8 = vector.load %arg4[%c0_6, %c0_7] : memref<128x128xf32, #tpu.memory_space<vmem>>, vector<128x128xf32>
    %cst_8 = arith.constant dense<0.000000e+00> : vector<8x128xf32>
    %9 = tpu.matmul %7, %8, %cst_8 {dimension_numbers = #tpu.dot_dimension_numbers<[1], [0], [0], [1], [0, 0, 1, 1], [], []>} : vector<8x128xf32>, vector<128x128xf32>, vector<8x128xf32> -> vector<8x128xf32>
    %c0_9 = arith.constant 0 : index
    %c0_10 = arith.constant 0 : index
    %10 = vector.load %arg5[%c0_9, %c0_10] : memref<1x128xf32, #tpu.memory_space<vmem>>, vector<1x128xf32>
    %11 = vector.broadcast %10 : vector<1x128xf32> to vector<8x128xf32>
    %12 = arith.addf %9, %11 : vector<8x128xf32>
    %c0_11 = arith.constant 0 : index
    %c0_12 = arith.constant 0 : index
    %13 = vector.load %arg6[%c0_11, %c0_12] : memref<8x128xf32, #tpu.memory_space<vmem>>, vector<8x128xf32>
    tpu.vector_store %arg6[%c0_11, %c0_12], %12 {strides = array<i32>} : memref<8x128xf32, #tpu.memory_space<vmem>>, vector<8x128xf32>,
    return
  }
  func.func @transform_0(%arg0: i32) -> (i32, i32) {
    %c0_i32 = arith.constant 0 : i32
    %c0_i32_0 = arith.constant 0 : i32
    return %arg0, %c0_i32 : i32, i32
  }
  func.func @transform_1(%arg0: i32) -> (i32, i32) {
    %c0_i32 = arith.constant 0 : i32
    %c0_i32_0 = arith.constant 0 : i32
    %c0_i32_1 = arith.constant 0 : i32
    return %c0_i32, %c0_i32_0 : i32, i32
  }
  func.func @transform_2(%arg0: i32) -> (i32, i32) {
    %c0_i32 = arith.constant 0 : i32
    %c0_i32_0 = arith.constant 0 : i32
    %c0_i32_1 = arith.constant 0 : i32
    return %c0_i32, %c0_i32_0 : i32, i32
  }
  func.func @transform_3(%arg0: i32) -> (i32, i32) {
    %c0_i32 = arith.constant 0 : i32
    %c0_i32_0 = arith.constant 0 : i32
    %c0_i32_1 = arith.constant 0 : i32
    return %c0_i32, %c0_i32_0 : i32, i32
  }
  func.func @transform_4(%arg0: i32) -> (i32, i32) {
    %c0_i32 = arith.constant 0 : i32
    %c0_i32_0 = arith.constant 0 : i32
    %c0_i32_1 = arith.constant 0 : i32
    return %c0_i32, %c0_i32_0 : i32, i32
  }
  func.func @transform_5(%arg0: i32) -> (i32, i32) {
    %c0_i32 = arith.constant 0 : i32
    %c0_i32_0 = arith.constant 0 : i32
    return %arg0, %c0_i32 : i32, i32
  }
}

</mosaic_0001>

<bundles_post_ra>
// kernel: tpu_custom_call.1
= control target key start
LH: loop header
LB: loop body
LE: loop exit
PB: predicated region body
PF: predicated region fallthrough
CT: control target
= control target key end

     0   :  { %10 = vsyncpa [#allocation3], 0  ;;  %s553_s0 = inlined_call_operand.hbm [shape: f32[8,896], index: 0, kind: input, shape index: {}]   ;;  %s554_s1 = inlined_call_operand.hbm [shape: f32[896,128], index: 1, kind: input, shape index: {}]   ;;  %s555_s2 = inlined_call_operand.vmem [shape: f32[1,128], index: 2, kind: input, shape index: {}]   ;;  %s556_s3 = inlined_call_operand.hbm [shape: f32[128,128], index: 3, kind: input, shape index: {}]   ;;  %s557_s4 = inlined_call_operand.vmem [shape: f32[1,128], index: 4, kind: input, shape index: {}]   ;;  %s558_s5 = inlined_call_operand.hbm [shape: f32[8,128], index: 5, kind: output, shape index: {}]  }
   0x1   :  { %11 = vsyncpa [#allocation6], 0  ;;  %s28_s20 = sshll.u32 %s554_s1, 4  ;;  %s29_s20 = int_to_ptr.hbm [resolvable:$true] %s28_s20 }
   0x2   :  { %12 = vsyncpa [#allocation4], 0  ;;  %s499_s21 = smov [#allocation5]   ;;  %s18_s25 = sshll.u32 %s553_s0, 4  ;;  %s19_s25 = int_to_ptr.hbm [resolvable:$true] %s18_s25 }
   0x3   :  { %s30_s22 = sshll.u32 %s499_s21, 4  ;;  %s500_s26 = smov 128   ;;  %s31_s22 = int_to_ptr.vmem [resolvable:$true] %s30_s22 }
   0x4   :  { %s501_s27 = smov 8   ;;  %s502_s28 = smov [#allocation2]  }
   0x5   :  { %36 = dma.hbm_to_vmem [thread:$0]  %s29_s20, 14336, %s31_s22, [#allocation6], %s500_s26, %s500_s26, %s501_s27  }
   0x6   :  { %s20_s29 = sshll.u32 %s502_s28, 4  ;;  %s43_s7 = sshll.u32 %s556_s3, 4  ;;  %s21_s29 = int_to_ptr.vmem [resolvable:$true] %s20_s29  ;;  %s44_s7 = int_to_ptr.hbm [resolvable:$true] %s43_s7 }
   0x7   :  { %23 = dma.hbm_to_vmem [thread:$0]  %s19_s25, 896, %s21_s29, [#allocation3]  }
   0x8   :  { %s503_s1 = smov [#allocation7]  }
   0x9   :  { %s45_s8 = sshll.u32 %s503_s1, 4  ;;  %s46_s8 = int_to_ptr.vmem [resolvable:$true] %s45_s8 }
   0xa   :  { %51 = dma.hbm_to_vmem [thread:$0]  %s44_s7, 2048, %s46_s8, [#allocation6], %s500_s26, %s500_s26, %s501_s27  }
   0xb   :  { %493 = dma.done.wait [#allocation3], 896  }
   0xc   :  { %494 = vsyncadd [#allocation3], 4294966400 }
   0xd   :  { %495 = dma.done.wait [#allocation6], 16384  }
   0xe   :  { %496 = vsyncadd [#allocation6], 4294950912  ;;  %v120_v0 = vld [vmem:[#allocation5 + $0x178] sm:$0xff]  ;;  %v119_v2 = vld [vmem:[#allocation5 + $0x170] sm:$0xff]  ;;  %s378_s14 = sshll.u32 %s558_s5, 4  ;;  %s379_s14 = int_to_ptr.hbm [resolvable:$true] %s378_s14 }
   0xf   :  { %v88_v1 = vld [vmem:[#allocation5 + $0x78] sm:$0xff]  ;;  %229 = vmatpush.msra.mxu2 %v120_v0  ;;  %v87_v3 = vld [vmem:[#allocation5 + $0x70] sm:$0xff]  ;;  %v118_v5 = vld [vmem:[#allocation5 + $0x168] sm:$0xff] }
  0x10   :  { %189 = vmatpush.msra.mxu0 %v88_v1  ;;  %v104_v4 = vld [vmem:[#allocation5 + $0xf8] sm:$0xff]  ;;  %v86_v6 = vld [vmem:[#allocation5 + $0x68] sm:$0xff]  ;;  %v103_v7 = vld [vmem:[#allocation5 + $0xf0] sm:$0xff] }
  0x11   :  { %209 = vmatpush.msra.mxu1 %v104_v4  ;;  %230 = vmatpush.msra.mxu2 %v119_v2  ;;  %v102_v8 = vld [vmem:[#allocation5 + $0xe8] sm:$0xff]  ;;  %v117_v9 = vld [vmem:[#allocation5 + $0x160] sm:$0xff]  ;;  %v116_v12 = vld [vmem:[#allocation5 + $0x158] sm:$0xff] }
  0x12   :  { %190 = vmatpush.msra.mxu0 %v87_v3  ;;  %v85_v10 = vld [vmem:[#allocation5 + $0x60] sm:$0xff]  ;;  %v84_v13 = vld [vmem:[#allocation5 + $0x58] sm:$0xff]  ;;  %v115_v15 = vld [vmem:[#allocation5 + $0x150] sm:$0xff] }
  0x13   :  { %210 = vmatpush.msra.mxu1 %v103_v7  ;;  %231 = vmatpush.msra.mxu2 %v118_v5  ;;  %v101_v11 = vld [vmem:[#allocation5 + $0xe0] sm:$0xff]  ;;  %v100_v14 = vld [vmem:[#allocation5 + $0xd8] sm:$0xff]  ;;  %v83_v16 = vld [vmem:[#allocation5 + $0x50] sm:$0xff] }
  0x14   :  { %191 = vmatpush.msra.mxu0 %v86_v6  ;;  %v99_v17 = vld [vmem:[#allocation5 + $0xd0] sm:$0xff]  ;;  %v114_v18 = vld [vmem:[#allocation5 + $0x148] sm:$0xff]  ;;  %v113_v21 = vld [vmem:[#allocation5 + $0x140] sm:$0xff] }
  0x15   :  { %211 = vmatpush.msra.mxu1 %v102_v8  ;;  %232 = vmatpush.msra.mxu2 %v117_v9  ;;  %v82_v19 = vld [vmem:[#allocation5 + $0x48] sm:$0xff]  ;;  %v81_v22 = vld [vmem:[#allocation5 + $0x40] sm:$0xff]  ;;  %v136_v23 = vld [vmem:[#allocation5 + $0x1f8] sm:$0xff] }
  0x16   :  { %192 = vmatpush.msra.mxu0 %v85_v10  ;;  %v98_v20 = vld [vmem:[#allocation5 + $0xc8] sm:$0xff]  ;;  %v97_v24 = vld [vmem:[#allocation5 + $0xc0] sm:$0xff]  ;;  %v135_v25 = vld [vmem:[#allocation5 + $0x1f0] sm:$0xff]  ;;  %249 = vmatpush.msra.mxu3 %v136_v23 }
  0x17   :  { %212 = vmatpush.msra.mxu1 %v101_v11  ;;  %233 = vmatpush.msra.mxu2 %v116_v12  ;;  %v112_v26 = vld [vmem:[#allocation5 + $0x138] sm:$0xff]  ;;  %v134_v29 = vld [vmem:[#allocation5 + $0x1e8] sm:$0xff]  ;;  %v111_v30 = vld [vmem:[#allocation5 + $0x130] sm:$0xff] }
  0x18   :  { %193 = vmatpush.msra.mxu0 %v84_v13  ;;  %v80_v27 = vld [vmem:[#allocation5 + $0x38] sm:$0xff]  ;;  %v79_v31 = vld [vmem:[#allocation5 + $0x30] sm:$0xff]  ;;  %250 = vmatpush.msra.mxu3 %v135_v25  ;;  %v133_v33 = vld [vmem:[#allocation5 + $0x1e0] sm:$0xff] }
  0x19   :  { %213 = vmatpush.msra.mxu1 %v100_v14  ;;  %234 = vmatpush.msra.mxu2 %v115_v15  ;;  %v96_v28 = vld [vmem:[#allocation5 + $0xb8] sm:$0xff]  ;;  %v95_v32 = vld [vmem:[#allocation5 + $0xb0] sm:$0xff]  ;;  %v110_v34 = vld [vmem:[#allocation5 + $0x128] sm:$0xff] }
  0x1a   :  { %194 = vmatpush.msra.mxu0 %v83_v16  ;;  %v78_v35 = vld [vmem:[#allocation5 + $0x28] sm:$0xff]  ;;  %251 = vmatpush.msra.mxu3 %v134_v29  ;;  %v132_v37 = vld [vmem:[#allocation5 + $0x1d8] sm:$0xff]  ;;  %v109_v38 = vld [vmem:[#allocation5 + $0x120] sm:$0xff] }
  0x1b   :  { %214 = vmatpush.msra.mxu1 %v99_v17  ;;  %235 = vmatpush.msra.mxu2 %v114_v18  ;;  %v94_v36 = vld [vmem:[#allocation5 + $0xa8] sm:$0xff]  ;;  %v77_v39 = vld [vmem:[#allocation5 + $0x20] sm:$0xff]  ;;  %v131_v41 = vld [vmem:[#allocation5 + $0x1d0] sm:$0xff] }
  0x1c   :  { %195 = vmatpush.msra.mxu0 %v82_v19  ;;  %252 = vmatpush.msra.mxu3 %v133_v33  ;;  %v93_v40 = vld [vmem:[#allocation5 + $0xa0] sm:$0xff]  ;;  %v108_v42 = vld [vmem:[#allocation5 + $0x118] sm:$0xff]  ;;  %v130_v45 = vld [vmem:[#allocation5 + $0x1c8] sm:$0xff] }
  0x1d   :  { %215 = vmatpush.msra.mxu1 %v98_v20  ;;  %236 = vmatpush.msra.mxu2 %v113_v21  ;;  %v76_v43 = vld [vmem:[#allocation5 + $0x18] sm:$0xff]  ;;  %v107_v46 = vld [vmem:[#allocation5 + $0x110] sm:$0xff]  ;;  %v129_v49 = vld [vmem:[#allocation5 + $0x1c0] sm:$0xff] }
  0x1e   :  { %196 = vmatpush.msra.mxu0 %v81_v22  ;;  %253 = vmatpush.msra.mxu3 %v132_v37  ;;  %v92_v44 = vld [vmem:[#allocation5 + $0x98] sm:$0xff]  ;;  %v75_v47 = vld [vmem:[#allocation5 + $0x10] sm:$0xff]  ;;  %v106_v50 = vld [vmem:[#allocation5 + $0x108] sm:$0xff] }
  0x1f   :  { %216 = vmatpush.msra.mxu1 %v97_v24  ;;  %237 = vmatpush.msra.mxu2 %v112_v26  ;;  %v91_v48 = vld [vmem:[#allocation5 + $0x90] sm:$0xff]  ;;  %v74_v51 = vld [vmem:[#allocation5 + $0x8] sm:$0xff]  ;;  %v128_v53 = vld [vmem:[#allocation5 + $0x1b8] sm:$0xff] }
  0x20   :  { %197 = vmatpush.msra.mxu0 %v80_v27  ;;  %254 = vmatpush.msra.mxu3 %v131_v41  ;;  %v90_v52 = vld [vmem:[#allocation5 + $0x88] sm:$0xff]  ;;  %v105_v54 = vld [vmem:[#allocation5 + $0x100] sm:$0xff]  ;;  %v184_v56 = vld [vmem:[#allocation5 + $0x378] sm:$0xff] }
  0x21   :  { %217 = vmatpush.msra.mxu1 %v96_v28  ;;  %238 = vmatpush.msra.mxu2 %v111_v30  ;;  %v73_v55 = vld [vmem:[#allocation5] sm:$0xff]  ;;  %v152_v57 = vld [vmem:[#allocation5 + $0x278] sm:$0xff]  ;;  %v127_v59 = vld [vmem:[#allocation5 + $0x1b0] sm:$0xff] }
  0x22   :  { %198 = vmatpush.msra.mxu0 %v79_v31  ;;  %255 = vmatpush.msra.mxu3 %v130_v45  ;;  %v89_v58 = vld [vmem:[#allocation5 + $0x80] sm:$0xff]  ;;  %v183_v60 = vld [vmem:[#allocation5 + $0x370] sm:$0xff]  ;;  %v168_v62 = vld [vmem:[#allocation5 + $0x2f8] sm:$0xff] }
  0x23   :  { %218 = vmatpush.msra.mxu1 %v95_v32  ;;  %239 = vmatpush.msra.mxu2 %v110_v34  ;;  %v151_v61 = vld [vmem:[#allocation5 + $0x270] sm:$0xff]  ;;  %v126_v63 = vld [vmem:[#allocation5 + $0x1a8] sm:$0xff]  ;;  %v125_v3 = vld [vmem:[#allocation5 + $0x1a0] sm:$0xff] }
  0x24   :  { %199 = vmatpush.msra.mxu0 %v78_v35  ;;  %256 = vmatpush.msra.mxu3 %v129_v49  ;;  %v182_v0 = vld [vmem:[#allocation5 + $0x368] sm:$0xff]  ;;  %v167_v2 = vld [vmem:[#allocation5 + $0x2f0] sm:$0xff]  ;;  %v181_v4 = vld [vmem:[#allocation5 + $0x360] sm:$0xff] }
  0x25   :  { %219 = vmatpush.msra.mxu1 %v94_v36  ;;  %240 = vmatpush.msra.mxu2 %v109_v38  ;;  %v150_v1 = vld [vmem:[#allocation5 + $0x268] sm:$0xff]  ;;  %v149_v5 = vld [vmem:[#allocation5 + $0x260] sm:$0xff]  ;;  %v124_v7 = vld [vmem:[#allocation5 + $0x198] sm:$0xff] }
  0x26   :  { %200 = vmatpush.msra.mxu0 %v77_v39  ;;  %257 = vmatpush.msra.mxu3 %v128_v53  ;;  %v166_v6 = vld [vmem:[#allocation5 + $0x2e8] sm:$0xff]  ;;  %v180_v8 = vld [vmem:[#allocation5 + $0x358] sm:$0xff]  ;;  %v165_v10 = vld [vmem:[#allocation5 + $0x2e0] sm:$0xff] }
  0x27   :  { %220 = vmatpush.msra.mxu1 %v93_v40  ;;  %241 = vmatpush.msra.mxu2 %v108_v42  ;;  %v148_v9 = vld [vmem:[#allocation5 + $0x258] sm:$0xff]  ;;  %v123_v11 = vld [vmem:[#allocation5 + $0x190] sm:$0xff]  ;;  %v122_v15 = vld [vmem:[#allocation5 + $0x188] sm:$0xff] }
  0x28   :  { %201 = vmatpush.msra.mxu0 %v76_v43  ;;  %258 = vmatpush.msra.mxu3 %v127_v59  ;;  %v179_v12 = vld [vmem:[#allocation5 + $0x350] sm:$0xff]  ;;  %v164_v14 = vld [vmem:[#allocation5 + $0x2d8] sm:$0xff]  ;;  %v178_v16 = vld [vmem:[#allocation5 + $0x348] sm:$0xff] }
  0x29   :  { %221 = vmatpush.msra.mxu1 %v92_v44  ;;  %242 = vmatpush.msra.mxu2 %v107_v46  ;;  %v147_v13 = vld [vmem:[#allocation5 + $0x250] sm:$0xff]  ;;  %v146_v17 = vld [vmem:[#allocation5 + $0x248] sm:$0xff]  ;;  %v68_v19 = vld [vmem:[#allocation2 + $0x10] sm:$0xff] }
  0x2a   :  { %202 = vmatpush.msra.mxu0 %v75_v47  ;;  %259 = vmatpush.msra.mxu3 %v126_v63  ;;  %v163_v18 = vld [vmem:[#allocation5 + $0x2d0] sm:$0xff]  ;;  %v177_v20 = vld [vmem:[#allocation5 + $0x340] sm:$0xff]  ;;  %v162_v22 = vld [vmem:[#allocation5 + $0x2c8] sm:$0xff] }
  0x2b   :  { %222 = vmatpush.msra.mxu1 %v91_v48  ;;  %243 = vmatpush.msra.mxu2 %v106_v50  ;;  %v145_v21 = vld [vmem:[#allocation5 + $0x240] sm:$0xff]  ;;  %v176_v24 = vld [vmem:[#allocation5 + $0x338] sm:$0xff]  ;;  %v66_v27 = vld [vmem:[#allocation2] sm:$0xff] }
  0x2c   :  { %203 = vmatpush.msra.mxu0 %v74_v51  ;;  %260 = vmatpush.msra.mxu3 %v125_v3  ;;  %v121_v23 = vld [vmem:[#allocation5 + $0x180] sm:$0xff]  ;;  %v144_v25 = vld [vmem:[#allocation5 + $0x238] sm:$0xff]  ;;  %v175_v28 = vld [vmem:[#allocation5 + $0x330] sm:$0xff] }
  0x2d   :  { %223 = vmatpush.msra.mxu1 %v90_v52  ;;  %244 = vmatpush.msra.mxu2 %v105_v54  ;;  %v161_v26 = vld [vmem:[#allocation5 + $0x2c0] sm:$0xff]  ;;  %v143_v29 = vld [vmem:[#allocation5 + $0x230] sm:$0xff]  ;;  %v160_v30 = vld [vmem:[#allocation5 + $0x2b8] sm:$0xff] }
  0x2e   :  { %204 = vmatpush.msra.mxu0 %v73_v55  ;;  %261 = vmatpush.msra.mxu3 %v124_v7  ;;  %v69_v31 = vld [vmem:[#allocation2 + $0x18] sm:$0xff]  ;;  %v174_v32 = vld [vmem:[#allocation5 + $0x328] sm:$0xff]  ;;  %v159_v34 = vld [vmem:[#allocation5 + $0x2b0] sm:$0xff] }
  0x2f   :  { %309 = vmatpush.msrb.mxu2 %v184_v56  ;;  %224 = vmatpush.msra.mxu1 %v89_v58  ;;  %v142_v33 = vld [vmem:[#allocation5 + $0x228] sm:$0xff]  ;;  %v345_v35 = vld [vmem:[#allocation7 + $0x78] sm:$0xff]  ;;  %v173_v36 = vld [vmem:[#allocation5 + $0x320] sm:$0xff] }
  0x30   :  { %269 = vmatpush.msrb.mxu0 %v152_v57  ;;  %262 = vmatpush.msra.mxu3 %v123_v11  ;;  %v141_v37 = vld [vmem:[#allocation5 + $0x220] sm:$0xff]  ;;  %v158_v38 = vld [vmem:[#allocation5 + $0x2a8] sm:$0xff]  ;;  %v344_v39 = vld [vmem:[#allocation7 + $0x70] sm:$0xff] }
  0x31   :  { %310 = vmatpush.msrb.mxu2 %v183_v60  ;;  %289 = vmatpush.msrb.mxu1 %v168_v62  ;;  %v172_v40 = vld [vmem:[#allocation5 + $0x318] sm:$0xff]  ;;  %v157_v42 = vld [vmem:[#allocation5 + $0x2a0] sm:$0xff]  ;;  %v343_v43 = vld [vmem:[#allocation7 + $0x68] sm:$0xff] }
  0x32   :  { %270 = vmatpush.msrb.mxu0 %v151_v61  ;;  %263 = vmatpush.msra.mxu3 %v122_v15  ;;  %v140_v41 = vld [vmem:[#allocation5 + $0x218] sm:$0xff]  ;;  %v171_v44 = vld [vmem:[#allocation5 + $0x310] sm:$0xff]  ;;  %v170_v48 = vld [vmem:[#allocation5 + $0x308] sm:$0xff] }
  0x33   :  { %311 = vmatpush.msrb.mxu2 %v182_v0  ;;  %290 = vmatpush.msrb.mxu1 %v167_v2  ;;  %v67_v45 = vld [vmem:[#allocation2 + $0x8] sm:$0xff]  ;;  %v156_v47 = vld [vmem:[#allocation5 + $0x298] sm:$0xff]  ;;  %v342_v49 = vld [vmem:[#allocation7 + $0x60] sm:$0xff] }
  0x34   :  { %271 = vmatpush.msrb.mxu0 %v150_v1  ;;  %245 = vmatmul.f32.vlgmr.msra.gmra.mxu2 %v68_v19  ;;  %v139_v46 = vld [vmem:[#allocation5 + $0x210] sm:$0xff]  ;;  %v138_v50 = vld [vmem:[#allocation5 + $0x208] sm:$0xff]  ;;  %v169_v52 = vld [vmem:[#allocation5 + $0x300] sm:$0xff] }
  0x35   :  { %312 = vmatpush.msrb.mxu2 %v181_v4  ;;  %291 = vmatpush.msrb.mxu1 %v166_v6  ;;  %v155_v51 = vld [vmem:[#allocation5 + $0x290] sm:$0xff]  ;;  %v341_v53 = vld [vmem:[#allocation7 + $0x58] sm:$0xff]  ;;  %v137_v55 = vld [vmem:[#allocation5 + $0x200] sm:$0xff] }
  0x36   :  { %272 = vmatpush.msrb.mxu0 %v149_v5  ;;  %264 = vmatpush.msra.mxu3 %v121_v23  ;;  %v72_v54 = vld [vmem:[#allocation2 + $0x30] sm:$0xff]  ;;  %v154_v56 = vld [vmem:[#allocation5 + $0x288] sm:$0xff]  ;;  %v340_v58 = vld [vmem:[#allocation7 + $0x50] sm:$0xff] }
  0x37   :  { %313 = vmatpush.msrb.mxu2 %v180_v8  ;;  %292 = vmatpush.msrb.mxu1 %v165_v10  ;;  %v70_v57 = vld [vmem:[#allocation2 + $0x20] sm:$0xff]  ;;  %v153_v59 = vld [vmem:[#allocation5 + $0x280] sm:$0xff]  ;;  %v71_v60 = vld [vmem:[#allocation2 + $0x28] sm:$0xff] }
  0x38   :  { %273 = vmatpush.msrb.mxu0 %v148_v9  ;;  %265 = vmatmul.f32.vlgmr.msra.gmra.mxu3 %v69_v31  ;;  %v339_v61 = vld [vmem:[#allocation7 + $0x48] sm:$0xff]  ;;  %v338_v62 = vld [vmem:[#allocation7 + $0x40] sm:$0xff]  ;;  %v337_v63 = vld [vmem:[#allocation7 + $0x38] sm:$0xff] }
  0x39   :  { %314 = vmatpush.msrb.mxu2 %v179_v12  ;;  %293 = vmatpush.msrb.mxu1 %v164_v14  ;;  %v336_v0 = vld [vmem:[#allocation7 + $0x30] sm:$0xff]  ;;  %v335_v1 = vld [vmem:[#allocation7 + $0x28] sm:$0xff]  ;;  %v334_v2 = vld [vmem:[#allocation7 + $0x20] sm:$0xff] }
  0x3a   :  { %274 = vmatpush.msrb.mxu0 %v147_v13  ;;  %350 = vmatpush.msrb.mxu3 %v345_v35  ;;  %v333_v3 = vld [vmem:[#allocation7 + $0x18] sm:$0xff]  ;;  %v332_v4 = vld [vmem:[#allocation7 + $0x10] sm:$0xff]  ;;  %v331_v5 = vld [vmem:[#allocation7 + $0x8] sm:$0xff] }
  0x3b   :  { %315 = vmatpush.msrb.mxu2 %v178_v16  ;;  %294 = vmatpush.msrb.mxu1 %v163_v18  ;;  %v330_v6 = vld [vmem:[#allocation7] sm:$0xff]  ;;  %v395_v7 = vld [vmem:[%s555_s2] ss:$0 sm:$0xff]  ;;  %s504_s2 = smov [#allocation8]  }
  0x3c   :  { %275 = vmatpush.msrb.mxu0 %v146_v17  ;;  %351 = vmatpush.msrb.mxu3 %v344_v39  ;;  %v396_v23 = vld [vmem:[%s557_s4] ss:$0 sm:$0xff]  ;;  %s376_s11 = sshll.u32 %s504_s2, 4  ;;  %s377_s11 = int_to_ptr.vmem [resolvable:$true] %s376_s11 }
  0x3d   :  { %316 = vmatpush.msrb.mxu2 %v177_v20  ;;  %295 = vmatpush.msrb.mxu1 %v162_v22 }
  0x3e   :  { %276 = vmatpush.msrb.mxu0 %v145_v21  ;;  %352 = vmatpush.msrb.mxu3 %v343_v43 }
  0x3f   :  { %317 = vmatpush.msrb.mxu2 %v176_v24  ;;  %296 = vmatpush.msrb.mxu1 %v161_v26 }
  0x40   :  { %277 = vmatpush.msrb.mxu0 %v144_v25  ;;  %225 = vmatmul.f32.vlgmr.msra.gmra.mxu1 %v67_v45 }
  0x41   :  { %205 = vmatmul.f32.vlgmr.msra.gmra.mxu0 %v66_v27  ;;  %318 = vmatpush.msrb.mxu2 %v175_v28 }
  0x42   :  { %278 = vmatpush.msrb.mxu0 %v143_v29  ;;  %297 = vmatpush.msrb.mxu1 %v160_v30 }
  0x43   :  { %319 = vmatpush.msrb.mxu2 %v174_v32  ;;  %353 = vmatpush.msrb.mxu3 %v342_v49 }
  0x44   :  { %279 = vmatpush.msrb.mxu0 %v142_v33  ;;  %298 = vmatpush.msrb.mxu1 %v159_v34 }
  0x45   :  { %320 = vmatpush.msrb.mxu2 %v173_v36  ;;  %354 = vmatpush.msrb.mxu3 %v341_v53 }
  0x46   :  { %280 = vmatpush.msrb.mxu0 %v141_v37  ;;  %299 = vmatpush.msrb.mxu1 %v158_v38 }
  0x47   :  { %321 = vmatpush.msrb.mxu2 %v172_v40  ;;  %355 = vmatpush.msrb.mxu3 %v340_v58 }
  0x48   :  { %281 = vmatpush.msrb.mxu0 %v140_v41  ;;  %300 = vmatpush.msrb.mxu1 %v157_v42 }
  0x49   :  { %322 = vmatpush.msrb.mxu2 %v171_v44  ;;  %356 = vmatpush.msrb.mxu3 %v339_v61 }
  0x4a   :  { %282 = vmatpush.msrb.mxu0 %v139_v46  ;;  %301 = vmatpush.msrb.mxu1 %v156_v47 }
  0x4b   :  { %323 = vmatpush.msrb.mxu2 %v170_v48  ;;  %357 = vmatpush.msrb.mxu3 %v338_v62 }
  0x4c   :  { %283 = vmatpush.msrb.mxu0 %v138_v50  ;;  %302 = vmatpush.msrb.mxu1 %v155_v51 }
  0x4d   :  { %324 = vmatpush.msrb.mxu2 %v169_v52  ;;  %358 = vmatpush.msrb.mxu3 %v337_v63 }
  0x4e   :  { %325 = vmatmul.f32.vlgmr.msrb.gmra.mxu2 %v72_v54  ;;  %284 = vmatpush.msrb.mxu0 %v137_v55 }
  0x4f   :  { %303 = vmatpush.msrb.mxu1 %v154_v56  ;;  %285 = vmatmul.f32.vlgmr.msrb.gmra.mxu0 %v70_v57 }
  0x50   :  { %359 = vmatpush.msrb.mxu3 %v336_v0 }
  0x51   :  { %304 = vmatpush.msrb.mxu1 %v153_v59 }
  0x52   :  { %305 = vmatmul.f32.vlgmr.msrb.gmra.mxu1 %v71_v60  ;;  %360 = vmatpush.msrb.mxu3 %v335_v1 }
  0x54   :  { %361 = vmatpush.msrb.mxu3 %v334_v2 }
  0x56   :  { %362 = vmatpush.msrb.mxu3 %v333_v3 }
  0x58   :  { %363 = vmatpush.msrb.mxu3 %v332_v4 }
  0x5a   :  { %364 = vmatpush.msrb.mxu3 %v331_v5 }
  0x5c   :  { %365 = vmatpush.msrb.mxu3 %v330_v6 }
  0xb7   :  { %v246_v11 = vpop.f32.mrf.mxu2 }
  0xbb   :  { %v266_v13 = vpop.f32.mrf.mxu3 }
  0xbd   :  { %v226_v10 = vpop.f32.mrf.mxu1 }
  0xbe   :  { %v206_v8 = vpop.f32.mrf.mxu0 }
  0xbf   :  { %v207_v9 = vadd.f32 %v395_v7, %v206_v8 }
  0xc1   :  { %v227_v12 = vadd.f32 %v226_v10, %v207_v9 }
  0xc3   :  { %v247_v14 = vadd.f32 %v246_v11, %v227_v12 }
  0xc5   :  { %v267_v15 = vadd.f32 %v266_v13, %v247_v14 }
  0xcc   :  { %v286_v16 = vpop.f32.mrf.mxu0 }
  0xcd   :  { %v287_v17 = vadd.f32 %v286_v16, %v267_v15 }
  0xcf   :  { %v306_v18 = vpop.f32.mrf.mxu1 }
  0xd0   :  { %v307_v19 = vadd.f32 %v306_v18, %v287_v17 }
  0xd1   :  { %v326_v20 = vpop.f32.mrf.mxu2 }
  0xd2   :  { %v327_v21 = vadd.f32 %v326_v20, %v307_v19 }
  0xd4   :  { %v329_v22 = vmax.f32 %v327_v21, 0.0 }
  0xd6   :  { %366 = vmatmul.f32.vlgmr.msrb.gmra.mxu3 %v329_v22 }
 0x159   :  { %v367_v24 = vpop.f32.mrf.mxu3 }
 0x15a   :  { %v368_v25 = vadd.f32 %v396_v23, %v367_v24 }
 0x15c   :  { %370 = vst [vmem:[#allocation8] sm:$0xff] %v368_v25 }
 0x15d   :  { %381 = dma.vmem_to_hbm [thread:$0]  %s377_s11, 128, %s379_s14, [#allocation4]  }
 0x15e   :  { %497 = dma.done.wait [#allocation4], 128  }
 0x15f   :  { %498 = vsyncadd [#allocation4], 4294967168 }
 0x160   :  { %386 = vsyncpa [#allocation3], 1 }
 0x161   :  { %387 = vsyncpa [#allocation6], 1 }
 0x162   :  { %388 = vsyncpa [#allocation4], 1 }

</bundles_post_ra>
